<compile_context>
chip_gen: v7x
topology: tpu7x:2x2x1
jax: 0.10.0
libtpu: 0.0.40
codegen_flags: <defaults>
</compile_context>

<pallas_src>
import jax
import jax.numpy as jnp
from jax.experimental import pallas as pl
from jax.experimental.pallas import tpu as pltpu

# Module hyper-parameters (from the PyTorch script)
INPUT_SIZE = 1
NUM_HIDDEN = 18
NUM_LAYERS = 1
BATCH_SIZE = 1
SEQ_LEN = 8   # small example sequence length

# Rows of the packed parameter operand
_ROW_WIH = 0   # W_ih^T (I == 1, so one row of length H)
_ROW_BIAS = 1  # b_ih + b_hh (pre-summed)
_ROW_WOUT = 2  # W_out (1, H) as stored by nn.Linear
_ROW_BOUT = 3  # b_out broadcast across H


def rnn_kernel(x2_ref, whh_t_ref, pk_ref, o_ref, h_out_ref):
    """Single-layer Elman RNN (tanh) + Linear head.

    x2_ref    : (S*B, 1)   time-major input, flattened over (t, b)
    whh_t_ref : (H, H)     W_hh transposed
    pk_ref    : (8, H)     packed small params (rows: w_ih^T, bias, w_out, b_out)
    o_ref     : (S*B, 1)   head output (reshaped to (S, B, 1) outside)
    h_out_ref : (L, B, H)  final hidden state (L = 1)
    """
    sb, _ = x2_ref.shape
    _, batch, hdim = h_out_ref.shape
    seq_len = sb // batch

    # ---- Hoisted, time-independent prologue (runs once) ----
    pk = pk_ref[...]                                   # (8, H), one load
    wih_row = pk[_ROW_WIH:_ROW_WIH + 1, :]             # (1, H)
    bias = pk[_ROW_BIAS:_ROW_BIAS + 1, :]              # (1, H)
    wout_row = pk[_ROW_WOUT:_ROW_WOUT + 1, :]          # (1, H)
    bout = pk[_ROW_BOUT:_ROW_BOUT + 1, 0:1]            # (1, 1)

    # I == 1  =>  input projection is a VPU broadcast-multiply for all steps.
    pre_in = x2_ref[...] * wih_row + bias              # (S*B, H)
    whh_t = whh_t_ref[...]                             # (H, H), loaded once

    # ---- Serial recurrence: only h @ W_hh^T + tanh on the critical path ----
    # h and all per-step hidden states are carried in vregs; nothing is
    # round-tripped through VMEM inside the loop.
    h = jnp.zeros((batch, hdim), jnp.float32)
    hs_rows = []
    for t in range(seq_len):                           # static unrolled loop (S = 8)
        row = t * batch
        pre = pre_in[row:row + batch, :] + jnp.dot(
            h, whh_t, preferred_element_type=jnp.float32)
        h = jnp.tanh(pre)                              # (B, H)
        hs_rows.append(h)

    h_out_ref[0] = h.astype(h_out_ref.dtype)

    # ---- Linear head: in-register stack + VPU multiply + lane reduce ----
    hs = jnp.concatenate(hs_rows, axis=0)              # (S*B, H), fits one vreg tile
    o = jnp.sum(hs * wout_row, axis=-1, keepdims=True) + bout   # (S*B, 1)
    o_ref[...] = o.astype(o_ref.dtype)


def prepare_params(params):
    """One-time parameter packing (outside the per-call path).

    Returns (whh_t, packed) where packed is a single (8, H) f32 operand:
      row 0: W_ih^T (1 row, since input_size == 1)
      row 1: b_ih + b_hh (pre-summed)
      row 2: W_out row
      row 3: b_out broadcast across H
      rows 4-7: zero padding (sublane alignment)
    """
    w_ih, w_hh, b_ih, b_hh, w_out, b_out = params
    h = NUM_HIDDEN
    packed = jnp.zeros((8, h), jnp.float32)
    packed = packed.at[_ROW_WIH].set(w_ih.reshape(h))
    packed = packed.at[_ROW_BIAS].set(b_ih + b_hh)
    packed = packed.at[_ROW_WOUT].set(w_out.reshape(h))
    packed = packed.at[_ROW_BOUT].set(jnp.full((h,), b_out[0], jnp.float32))
    whh_t = jnp.transpose(w_hh)                        # (H, H)
    return whh_t, packed


def rnn_forward(x, whh_t, packed):
    """Pallas wrapper. x: (seq, batch, input_size=1). Returns (o, hidden)."""
    seq_len, batch, input_size = x.shape
    assert input_size == INPUT_SIZE == 1

    x2 = x.reshape(seq_len * batch, input_size)        # (S*B, 1) -- only per-call glue

    vmem = pl.BlockSpec(memory_space=pltpu.MemorySpace.VMEM)
    o_flat, hidden = pl.pallas_call(
        rnn_kernel,
        out_shape=(
            jax.ShapeDtypeStruct((seq_len * batch, 1), jnp.float32),
            jax.ShapeDtypeStruct((NUM_LAYERS, batch, NUM_HIDDEN), jnp.float32),
        ),
        in_specs=[vmem, vmem, vmem],
        out_specs=(vmem, vmem),
    )(x2, whh_t, packed)

    o = o_flat.reshape(seq_len, batch, 1)              # back to (S, B, 1)
    return o, hidden


def rnn_reference(x, params):
    """Pure-JAX reference for correctness checking."""
    w_ih, w_hh, b_ih, b_hh, w_out, b_out = params
    seq_len, batch, _ = x.shape
    h = jnp.zeros((batch, NUM_HIDDEN), jnp.float32)
    outs = []
    for t in range(seq_len):
        h = jnp.tanh(x[t] @ w_ih.T + b_ih + h @ w_hh.T + b_hh)
        outs.append(h @ w_out.T + b_out)
    o = jnp.stack(outs, axis=0)
    return o, h[None]


def init_params(key):
    """Deterministic init mirroring PyTorch's U(-1/sqrt(H), 1/sqrt(H))."""
    ks = jax.random.split(key, 6)
    bound = 1.0 / jnp.sqrt(jnp.float32(NUM_HIDDEN))
    u = lambda k, shape: jax.random.uniform(k, shape, jnp.float32, -bound, bound)
    w_ih = u(ks[0], (NUM_HIDDEN, INPUT_SIZE))
    w_hh = u(ks[1], (NUM_HIDDEN, NUM_HIDDEN))
    b_ih = u(ks[2], (NUM_HIDDEN,))
    b_hh = u(ks[3], (NUM_HIDDEN,))
    w_out = u(ks[4], (1, NUM_HIDDEN))
    b_out = u(ks[5], (1,))
    return (w_ih, w_hh, b_ih, b_hh, w_out, b_out)


if __name__ == "__main__":
    key = jax.random.PRNGKey(0)
    k_x, k_p = jax.random.split(key)
    params = init_params(k_p)

    # One-time parameter packing / transpose (outside the per-call path).
    whh_t, packed = prepare_params(params)
    jax.block_until_ready((whh_t, packed))

    # sine-wave-like input, shape (seq, batch, input_size)
    t = jnp.linspace(0.0, 2.0 * jnp.pi, SEQ_LEN)
    x = jnp.sin(t).reshape(SEQ_LEN, BATCH_SIZE, INPUT_SIZE).astype(jnp.float32)
    x = x + 0.01 * jax.random.normal(k_x, x.shape, jnp.float32)

    o, hidden = rnn_forward(x, whh_t, packed)
    jax.block_until_ready((o, hidden))

    o_ref, h_ref = rnn_reference(x, params)
    assert o.shape == (SEQ_LEN, BATCH_SIZE, 1)
    assert hidden.shape == (NUM_LAYERS, BATCH_SIZE, NUM_HIDDEN)
    assert jnp.allclose(o, o_ref, atol=1e-5, rtol=1e-5)
    assert jnp.allclose(hidden, h_ref, atol=1e-5, rtol=1e-5)

    print("KERNEL_OK")
</pallas_src>

<mosaic_0001>
module attributes {stable_mosaic.version = 11 : i64} {
  func.func @rnn_kernel(%arg0: memref<8x1xf32, #tpu.memory_space<vmem>>, %arg1: memref<18x18xf32, #tpu.memory_space<vmem>>, %arg2: memref<8x18xf32, #tpu.memory_space<vmem>>, %arg3: memref<8x1xf32, #tpu.memory_space<vmem>>, %arg4: memref<1x1x18xf32, #tpu.memory_space<vmem>>) attributes {dimension_semantics = [], scalar_prefetch = 0 : i64, scratch_operands = 0 : i64, tpu.core_type = #tpu.core_type<tc>} {
    %c0 = arith.constant 0 : index
    %c0_0 = arith.constant 0 : index
    %0 = vector.load %arg2[%c0, %c0_0] : memref<8x18xf32, #tpu.memory_space<vmem>>, vector<8x18xf32>
    %1 = vector.extract_strided_slice %0 {offsets = [0, 0], sizes = [1, 18], strides = [1, 1]} : vector<8x18xf32> to vector<1x18xf32>
    %2 = vector.extract_strided_slice %0 {offsets = [1, 0], sizes = [1, 18], strides = [1, 1]} : vector<8x18xf32> to vector<1x18xf32>
    %3 = vector.extract_strided_slice %0 {offsets = [2, 0], sizes = [1, 18], strides = [1, 1]} : vector<8x18xf32> to vector<1x18xf32>
    %4 = vector.extract_strided_slice %0 {offsets = [3, 0], sizes = [1, 1], strides = [1, 1]} : vector<8x18xf32> to vector<1x1xf32>
    %c0_1 = arith.constant 0 : index
    %c0_2 = arith.constant 0 : index
    %5 = vector.load %arg0[%c0_1, %c0_2] : memref<8x1xf32, #tpu.memory_space<vmem>>, vector<8x1xf32>
    %6 = vector.broadcast %5 : vector<8x1xf32> to vector<8x18xf32>
    %7 = vector.broadcast %1 : vector<1x18xf32> to vector<8x18xf32>
    %8 = arith.mulf %6, %7 : vector<8x18xf32>
    %9 = vector.broadcast %2 : vector<1x18xf32> to vector<8x18xf32>
    %10 = arith.addf %8, %9 : vector<8x18xf32>
    %c0_3 = arith.constant 0 : index
    %c0_4 = arith.constant 0 : index
    %11 = vector.load %arg1[%c0_3, %c0_4] : memref<18x18xf32, #tpu.memory_space<vmem>>, vector<18x18xf32>
    %cst = arith.constant 0.000000e+00 : f32
    %12 = vector.broadcast %cst : f32 to vector<1x18xf32>
    %13 = vector.extract_strided_slice %10 {offsets = [0, 0], sizes = [1, 18], strides = [1, 1]} : vector<8x18xf32> to vector<1x18xf32>
    %cst_5 = arith.constant dense<0.000000e+00> : vector<1x18xf32>
    %14 = tpu.matmul %12, %11, %cst_5 {dimension_numbers = #tpu.dot_dimension_numbers<[1], [0], [0], [1], [0, 0, 1, 1], [], []>} : vector<1x18xf32>, vector<18x18xf32>, vector<1x18xf32> -> vector<1x18xf32>
    %15 = arith.addf %13, %14 : vector<1x18xf32>
    %16 = math.tanh %15 : vector<1x18xf32>
    %17 = vector.extract_strided_slice %10 {offsets = [1, 0], sizes = [1, 18], strides = [1, 1]} : vector<8x18xf32> to vector<1x18xf32>
    %cst_6 = arith.constant dense<0.000000e+00> : vector<1x18xf32>
    %18 = tpu.matmul %16, %11, %cst_6 {dimension_numbers = #tpu.dot_dimension_numbers<[1], [0], [0], [1], [0, 0, 1, 1], [], []>} : vector<1x18xf32>, vector<18x18xf32>, vector<1x18xf32> -> vector<1x18xf32>
    %19 = arith.addf %17, %18 : vector<1x18xf32>
    %20 = math.tanh %19 : vector<1x18xf32>
    %21 = vector.extract_strided_slice %10 {offsets = [2, 0], sizes = [1, 18], strides = [1, 1]} : vector<8x18xf32> to vector<1x18xf32>
    %cst_7 = arith.constant dense<0.000000e+00> : vector<1x18xf32>
    %22 = tpu.matmul %20, %11, %cst_7 {dimension_numbers = #tpu.dot_dimension_numbers<[1], [0], [0], [1], [0, 0, 1, 1], [], []>} : vector<1x18xf32>, vector<18x18xf32>, vector<1x18xf32> -> vector<1x18xf32>
    %23 = arith.addf %21, %22 : vector<1x18xf32>
    %24 = math.tanh %23 : vector<1x18xf32>
    %25 = vector.extract_strided_slice %10 {offsets = [3, 0], sizes = [1, 18], strides = [1, 1]} : vector<8x18xf32> to vector<1x18xf32>
    %cst_8 = arith.constant dense<0.000000e+00> : vector<1x18xf32>
    %26 = tpu.matmul %24, %11, %cst_8 {dimension_numbers = #tpu.dot_dimension_numbers<[1], [0], [0], [1], [0, 0, 1, 1], [], []>} : vector<1x18xf32>, vector<18x18xf32>, vector<1x18xf32> -> vector<1x18xf32>
    %27 = arith.addf %25, %26 : vector<1x18xf32>
    %28 = math.tanh %27 : vector<1x18xf32>
    %29 = vector.extract_strided_slice %10 {offsets = [4, 0], sizes = [1, 18], strides = [1, 1]} : vector<8x18xf32> to vector<1x18xf32>
    %cst_9 = arith.constant dense<0.000000e+00> : vector<1x18xf32>
    %30 = tpu.matmul %28, %11, %cst_9 {dimension_numbers = #tpu.dot_dimension_numbers<[1], [0], [0], [1], [0, 0, 1, 1], [], []>} : vector<1x18xf32>, vector<18x18xf32>, vector<1x18xf32> -> vector<1x18xf32>
    %31 = arith.addf %29, %30 : vector<1x18xf32>
    %32 = math.tanh %31 : vector<1x18xf32>
    %33 = vector.extract_strided_slice %10 {offsets = [5, 0], sizes = [1, 18], strides = [1, 1]} : vector<8x18xf32> to vector<1x18xf32>
    %cst_10 = arith.constant dense<0.000000e+00> : vector<1x18xf32>
    %34 = tpu.matmul %32, %11, %cst_10 {dimension_numbers = #tpu.dot_dimension_numbers<[1], [0], [0], [1], [0, 0, 1, 1], [], []>} : vector<1x18xf32>, vector<18x18xf32>, vector<1x18xf32> -> vector<1x18xf32>
    %35 = arith.addf %33, %34 : vector<1x18xf32>
    %36 = math.tanh %35 : vector<1x18xf32>
    %37 = vector.extract_strided_slice %10 {offsets = [6, 0], sizes = [1, 18], strides = [1, 1]} : vector<8x18xf32> to vector<1x18xf32>
    %cst_11 = arith.constant dense<0.000000e+00> : vector<1x18xf32>
    %38 = tpu.matmul %36, %11, %cst_11 {dimension_numbers = #tpu.dot_dimension_numbers<[1], [0], [0], [1], [0, 0, 1, 1], [], []>} : vector<1x18xf32>, vector<18x18xf32>, vector<1x18xf32> -> vector<1x18xf32>
    %39 = arith.addf %37, %38 : vector<1x18xf32>
    %40 = math.tanh %39 : vector<1x18xf32>
    %41 = vector.extract_strided_slice %10 {offsets = [7, 0], sizes = [1, 18], strides = [1, 1]} : vector<8x18xf32> to vector<1x18xf32>
    %cst_12 = arith.constant dense<0.000000e+00> : vector<1x18xf32>
    %42 = tpu.matmul %40, %11, %cst_12 {dimension_numbers = #tpu.dot_dimension_numbers<[1], [0], [0], [1], [0, 0, 1, 1], [], []>} : vector<1x18xf32>, vector<18x18xf32>, vector<1x18xf32> -> vector<1x18xf32>
    %43 = arith.addf %41, %42 : vector<1x18xf32>
    %44 = math.tanh %43 : vector<1x18xf32>
    %c0_13 = arith.constant 0 : index
    %c0_14 = arith.constant 0 : index
    %c0_15 = arith.constant 0 : index
    %45 = vector.load %arg4[%c0_13, %c0_14, %c0_15] : memref<1x1x18xf32, #tpu.memory_space<vmem>>, vector<1x1x18xf32>
    %46 = vector.shape_cast %45 : vector<1x1x18xf32> to vector<1x18xf32>
    %47 = vector.shape_cast %44 : vector<1x18xf32> to vector<1x1x18xf32>
    tpu.vector_store %arg4[%c0_13, %c0_14, %c0_15], %47 {strides = array<i32>} : memref<1x1x18xf32, #tpu.memory_space<vmem>>, vector<1x1x18xf32>,
    %48 = tpu.concatenate %16, %20, %24, %28, %32, %36, %40, %44 in 0 : vector<1x18xf32>, vector<1x18xf32>, vector<1x18xf32>, vector<1x18xf32>, vector<1x18xf32>, vector<1x18xf32>, vector<1x18xf32>, vector<1x18xf32> -> vector<8x18xf32>
    %49 = vector.broadcast %3 : vector<1x18xf32> to vector<8x18xf32>
    %50 = arith.mulf %48, %49 : vector<8x18xf32>
    %cst_16 = arith.constant dense<0.000000e+00> : vector<8xf32>
    %51 = vector.multi_reduction <add>, %50, %cst_16 [1] : vector<8x18xf32> to vector<8xf32>
    %52 = vector.shape_cast %51 : vector<8xf32> to vector<8x1xf32>
    %53 = vector.broadcast %4 : vector<1x1xf32> to vector<8x1xf32>
    %54 = arith.addf %52, %53 : vector<8x1xf32>
    %c0_17 = arith.constant 0 : index
    %c0_18 = arith.constant 0 : index
    %55 = vector.load %arg3[%c0_17, %c0_18] : memref<8x1xf32, #tpu.memory_space<vmem>>, vector<8x1xf32>
    tpu.vector_store %arg3[%c0_17, %c0_18], %54 {strides = array<i32>} : memref<8x1xf32, #tpu.memory_space<vmem>>, vector<8x1xf32>,
    return
  }
}

</mosaic_0001>

<bundles_post_ra>
// kernel: tpu_custom_call.1
= control target key start
LH: loop header
LB: loop body
LE: loop exit
PB: predicated region body
PF: predicated region fallthrough
CT: control target
= control target key end

     0   :  { %10 = vsyncpa [#allocation3], 0  ;;  %s1106_s0 = inlined_call_operand.vmem [shape: f32[8,1], index: 0, kind: input, shape index: {}]   ;;  %s1107_s1 = inlined_call_operand.hbm [shape: f32[18,18], index: 1, kind: input, shape index: {}]   ;;  %s1108_s2 = inlined_call_operand.vmem [shape: f32[8,18], index: 2, kind: input, shape index: {}]   ;;  %s1109_s3 = inlined_call_operand.vmem [shape: f32[8,1], index: 3, kind: output, shape index: {0}]   ;;  %s1110_s4 = inlined_call_operand.hbm [shape: f32[1,1,18], index: 4, kind: output, shape index: {1}]  }
   0x1   :  { %11 = vsyncpa [#allocation4], 0  ;;  %s948_s15 = smov [#allocation2]   ;;  %s900_s19 = scalar_lea.hbm %s1107_s1, 384 }
   0x2   :  { %s19_s16 = sshll.u32 %s948_s15, 4  ;;  %p901_p0 = scmp.ne.s32.totalorder %s1107_s1, %s900_s19  ;;  %s20_s16 = int_to_ptr.vmem [resolvable:$true] %s19_s16 }
   0x3   :  { %p904_p1 = scmp.lt.u32.totalorder %s900_s19, %s1107_s1 }
   0x5   :  { %p906_p2 = pnand %p904_p1, %p901_p0 }
   0x7   :  { %909 = shalt.err (!%p906_p2)
}
   0x8   :  { %s910_s24 = scalar_lea.vmem %s20_s16, 384  ;;  %p915_p4 = scmp.lt.s32.totalorder %s20_s16, %s20_s16 }
   0x9   :  { %p911_p3 = scmp.ne.s32.totalorder %s20_s16, %s910_s24  ;;  %p916_p5 = scmp.lt.s32.totalorder %s910_s24, %s910_s24 }
   0xb   :  { %p917_p6 = por %p916_p5, %p915_p4 }
   0xd   :  { %p918_p7 = pnand %p917_p6, %p911_p3 }
   0xf   :  { %921 = shalt.err (!%p918_p7)
}
  0x10   :  { %s949_s25 = smov 128   ;;  %s950_s26 = smov 8  }
  0x11   :  { %25 = dma.hbm_to_vmem [thread:$0]  %s1107_s1, 384, %s20_s16, [#allocation3], %s949_s25, %s949_s25, %s950_s26  }
  0x12   :  { %944 = dma.done.wait [#allocation3], 384  }
  0x13   :  { %945 = vsyncadd [#allocation3], 4294966912  ;;  %v951_v0 = vmov 0.0|0.0   ;;  %vm952_vm0 = vmmov 0   ;;  %v953_v1 = vmov 0.0   ;;  %v954_v2 = vmov 0  }
  0x14   :  { %851 = vmatprep.subr.bf16.mxu0 %v951_v0  ;;  %785 = vmatprep.mubr.msk.f32.mxu0 %vm952_vm0, %v953_v1  ;;  %v48_v3 = vld [vmem:[#allocation2] sm:$0xff]  ;;  %v49_v4 = vld [vmem:[#allocation2 + $0x8] sm:$0xff]  ;;  %v1007_v7 = vld [vmem:[#allocation2 + $0x10] sm:$0x3]  ;;  %vm55_vm1 = vcmask 1041408   ;;  %v38_v8 = vlaneseq  ;;  %vm51_vm2 = vcmask 146432  }
  0x15   :  { %883 = vset.pattern.permute.xlu0 %v954_v2  ;;  %854 = vmatprep.subr.bf16.mxu1 %v951_v0  ;;  %v999_v5 = vpack.c.bf16 %v49_v4, %v48_v3  ;;  %v32_v6 = vld [vmem:[%s1106_s0] sm:$0xff]  ;;  %vm685_vm3 = vcmask 1040384   ;;  %vm688_vm4 = vcmask 1042432   ;;  %vm690_vm5 = vcmask 1043456  }
  0x16   :  { %794 = vmatprep.mubr.msk.f32.mxu1 %vm952_vm0, %v953_v1  ;;  %35 = vperm.xlu0 %883, %v32_v6   ;;  %v1024_v9 = vshrl.u32 %v38_v8, 7  ;;  %v1030_v11 = vld [vmem:[%s1108_s2] sm:$0xff]  ;;  %vm692_vm6 = vcmask 1044480   ;;  %vm694_vm7 = vcmask 1045504   ;;  %vm696_vm8 = vcmask 1046528   ;;  %s955_s2 = smov [#allocation5]  }
  0x17   :  { %853 = vmatpush3.bf16.msra.mxu0 %v999_v5  ;;  %856 = vmatpush3.bf16.msra.mxu1 %v999_v5  ;;  %vm683_vm9 = vcmask 146439   ;;  %s721_s5 = sshll.u32 %s955_s2, 4  ;;  %s722_s5 = int_to_ptr.vmem [resolvable:$true] %s721_s5 }
  0x18   :  { %783 = vmatprep.subr.mxu0 %v953_v1  ;;  %792 = vmatprep.subr.mxu1 %v953_v1  ;;  %v40_v10 = vsub.s32 0, %v1024_v9  ;;  %v45_v12 = vsub.s32 1, %v1024_v9  ;;  %v700_v4 = vsub.s32 2, %v1024_v9  ;;  %s922_s6 = scalar_lea.vmem %s722_s5, 16  ;;  %s926_s7 = scalar_lea.vmem %s722_s5, 32 }
  0x19   :  { %p923_p8 = scmp.ne.s32.totalorder %s722_s5, %s922_s6  ;;  %p927_p9 = scmp.lt.s32.totalorder %s722_s5, %s722_s5 }
  0x1a   :  { %v41_v13 = vrot.slane %v1030_v11, %v40_v10  ;;  %v46_v16 = vrot.slane %v1030_v11, %v45_v12  ;;  %p928_p10 = scmp.lt.s32.totalorder %s926_s7, %s922_s6 }
  0x1b   :  { %784 = vmatpush3.msk.msra.mxu0 %vm55_vm1, %v1007_v7  ;;  %793 = vmatpush3.msk.msra.mxu1 %vm55_vm1, %v1007_v7 }
  0x1c   :  { %786 = vmatmul.mubr.f32.vlgmr.msra.gmra.mrb[0].mxu0 %v953_v1  ;;  %857 = vmatprep.subr.bf16.mxu0 %v951_v0  ;;  %p929_p11 = por %p928_p10, %p927_p9 }
  0x1d   :  { %859 = vmatpush3.bf16.msra.mxu0 %v999_v5  ;;  %803 = vmatprep.mubr.msk.f32.mxu0 %vm952_vm0, %v953_v1 }
  0x1e   :  { %801 = vmatprep.subr.mxu0 %v953_v1  ;;  %860 = vmatprep.subr.bf16.mxu1 %v951_v0  ;;  %p930_p12 = pnand %p929_p11, %p923_p8 }
  0x21   :  { %802 = vmatpush3.msk.msra.mxu0 %vm55_vm1, %v1007_v7 }
  0x22   :  { %863 = vmatprep.subr.bf16.mxu0 %v951_v0 }
  0x95   :  { %v36_v14 = vpop.permute.xlu0 %35 }
  0x96   :  { %v42_v15 = vmul.f32 %v41_v13, %v36_v14 }
  0x98   :  { %v1035_v17 = vadd.f32 %v46_v16, %v42_v15 }
  0xef   :  { %v125_v18 = vpop.f32.mrb[0].mxu0 }
  0xf0   :  { %v129_v19 = vadd.f32 %v125_v18, %v1035_v17  ;;  %v787_v20 = vpop.f32.mrb[1].mxu0 }
  0xf2   :  { %884 = vtanh.f32 %v129_v19 }
  0xfc   :  { %v885_v21 = vpop.eup %884 }
  0xfd   :  { %795 = vmatmul.mubr.msk.f32.vlgmr.msra.gmra.mrb[0].mxu1 %vm51_vm2, %v885_v21 }
  0xfe   :  { %862 = vmatpush3.bf16.msra.mxu1 %v999_v5  ;;  %812 = vmatprep.mubr.msk.f32.mxu1 %vm952_vm0, %v953_v1 }
  0xff   :  { %810 = vmatprep.subr.mxu1 %v953_v1 }
 0x102   :  { %811 = vmatpush3.msk.msra.mxu1 %vm55_vm1, %v1007_v7 }
 0x103   :  { %866 = vmatprep.subr.bf16.mxu1 %v951_v0 }
 0x1d0   :  { %v200_v22 = vpop.f32.mrb[0].mxu1 }
 0x1d1   :  { %v205_v23 = vrot.slane %v200_v22, 7  ;;  %v796_v24 = vpop.f32.mrb[1].mxu1 }
 0x1d3   :  { %v207_v25 = vadd.f32 %v205_v23, %v1035_v17 }
 0x1d5   :  { %886 = vtanh.f32 %v207_v25 }
 0x1df   :  { %v887_v26 = vpop.eup %886 }
 0x1e0   :  { %v210_v27 = vrot.slane %v887_v26, 1  ;;  %v686_v33 = vsel %vm685_vm3, %v885_v21, %v887_v26 }
 0x1e2   :  { %804 = vmatmul.mubr.msk.f32.vlgmr.msra.gmra.mrb[2].mxu0 %vm51_vm2, %v210_v27 }
 0x1e3   :  { %865 = vmatpush3.bf16.msra.mxu0 %v999_v5  ;;  %821 = vmatprep.mubr.msk.f32.mxu0 %vm952_vm0, %v953_v1 }
 0x1e4   :  { %819 = vmatprep.subr.mxu0 %v953_v1 }
 0x1e7   :  { %820 = vmatpush3.msk.msra.mxu0 %vm55_vm1, %v1007_v7 }
 0x1e8   :  { %869 = vmatprep.subr.bf16.mxu0 %v951_v0 }
 0x2b5   :  { %v279_v28 = vpop.f32.mrb[2].mxu0 }
 0x2b6   :  { %v284_v29 = vrot.slane %v279_v28, 6  ;;  %v805_v30 = vpop.f32.mrb[3].mxu0 }
 0x2b8   :  { %v286_v31 = vadd.f32 %v284_v29, %v1035_v17 }
 0x2ba   :  { %888 = vtanh.f32 %v286_v31 }
 0x2c4   :  { %v889_v32 = vpop.eup %888 }
 0x2c5   :  { %v289_v34 = vrot.slane %v889_v32, 2  ;;  %v687_v35 = vsel %vm55_vm1, %v686_v33, %v889_v32 }
 0x2c7   :  { %813 = vmatmul.mubr.msk.f32.vlgmr.msra.gmra.mrb[2].mxu1 %vm51_vm2, %v289_v34 }
 0x2c8   :  { %868 = vmatpush3.bf16.msra.mxu1 %v999_v5  ;;  %830 = vmatprep.mubr.msk.f32.mxu1 %vm952_vm0, %v953_v1 }
 0x2c9   :  { %828 = vmatprep.subr.mxu1 %v953_v1 }
 0x2cc   :  { %829 = vmatpush3.msk.msra.mxu1 %vm55_vm1, %v1007_v7 }
 0x2cd   :  { %872 = vmatprep.subr.bf16.mxu1 %v951_v0 }
 0x39a   :  { %v358_v36 = vpop.f32.mrb[2].mxu1 }
 0x39b   :  { %v363_v37 = vrot.slane %v358_v36, 5  ;;  %v814_v38 = vpop.f32.mrb[3].mxu1 }
 0x39d   :  { %v365_v39 = vadd.f32 %v363_v37, %v1035_v17 }
 0x39f   :  { %890 = vtanh.f32 %v365_v39 }
 0x3a9   :  { %v891_v40 = vpop.eup %890 }
 0x3aa   :  { %v368_v41 = vrot.slane %v891_v40, 3  ;;  %v689_v42 = vsel %vm688_vm4, %v687_v35, %v891_v40 }
 0x3ac   :  { %822 = vmatmul.mubr.msk.f32.vlgmr.msra.gmra.mrb[4].mxu0 %vm51_vm2, %v368_v41 }
 0x3ad   :  { %871 = vmatpush3.bf16.msra.mxu0 %v999_v5  ;;  %839 = vmatprep.mubr.msk.f32.mxu0 %vm952_vm0, %v953_v1 }
 0x3ae   :  { %837 = vmatprep.subr.mxu0 %v953_v1 }
 0x3b1   :  { %838 = vmatpush3.msk.msra.mxu0 %vm55_vm1, %v1007_v7 }
 0x47f   :  { %v437_v43 = vpop.f32.mrb[4].mxu0 }
 0x480   :  { %v442_v44 = vrot.slane %v437_v43, 4  ;;  %v823_v45 = vpop.f32.mrb[5].mxu0 }
 0x482   :  { %v444_v46 = vadd.f32 %v442_v44, %v1035_v17 }
 0x484   :  { %892 = vtanh.f32 %v444_v46 }
 0x48e   :  { %v893_v47 = vpop.eup %892 }
 0x48f   :  { %v447_v48 = vrot.slane %v893_v47, 4  ;;  %v691_v49 = vsel %vm690_vm5, %v689_v42, %v893_v47 }
 0x491   :  { %831 = vmatmul.mubr.msk.f32.vlgmr.msra.gmra.mrb[4].mxu1 %vm51_vm2, %v447_v48 }
 0x492   :  { %874 = vmatpush3.bf16.msra.mxu1 %v999_v5  ;;  %848 = vmatprep.mubr.msk.f32.mxu1 %vm952_vm0, %v953_v1  ;;  %v701_v5 = vrot.slane %v1030_v11, %v700_v4 }
 0x493   :  { %846 = vmatprep.subr.mxu1 %v953_v1 }
 0x496   :  { %847 = vmatpush3.msk.msra.mxu1 %vm55_vm1, %v1007_v7 }
 0x564   :  { %v516_v50 = vpop.f32.mrb[4].mxu1 }
 0x565   :  { %v521_v51 = vrot.slane %v516_v50, 3  ;;  %v832_v52 = vpop.f32.mrb[5].mxu1 }
 0x567   :  { %v523_v53 = vadd.f32 %v521_v51, %v1035_v17 }
 0x569   :  { %894 = vtanh.f32 %v523_v53 }
 0x573   :  { %v895_v54 = vpop.eup %894 }
 0x574   :  { %v526_v55 = vrot.slane %v895_v54, 5  ;;  %v693_v56 = vsel %vm692_vm6, %v691_v49, %v895_v54 }
 0x576   :  { %840 = vmatmul.mubr.msk.f32.vlgmr.msra.gmra.mrb[6].mxu0 %vm51_vm2, %v526_v55 }
 0x649   :  { %v595_v57 = vpop.f32.mrb[6].mxu0 }
 0x64a   :  { %v600_v58 = vrot.slane %v595_v57, 2  ;;  %v841_v59 = vpop.f32.mrb[7].mxu0 }
 0x64c   :  { %v602_v60 = vadd.f32 %v600_v58, %v1035_v17 }
 0x64e   :  { %896 = vtanh.f32 %v602_v60 }
 0x658   :  { %v897_v61 = vpop.eup %896 }
 0x659   :  { %v605_v62 = vrot.slane %v897_v61, 6  ;;  %v695_v63 = vsel %vm694_vm7, %v693_v56, %v897_v61 }
 0x65b   :  { %849 = vmatmul.mubr.msk.f32.vlgmr.msra.gmra.mrb[6].mxu1 %vm51_vm2, %v605_v62 }
 0x72e   :  { %v674_v0 = vpop.f32.mrb[6].mxu1 }
 0x72f   :  { %v679_v1 = vrot.slane %v674_v0, 1  ;;  %v850_v2 = vpop.f32.mrb[7].mxu1 }
 0x731   :  { %v681_v3 = vadd.f32 %v679_v1, %v1035_v17 }
 0x733   :  { %898 = vtanh.f32 %v681_v3 }
 0x73d   :  { %v899_v6 = vpop.eup %898 }
 0x73e   :  { %v697_v7 = vsel %vm696_vm8, %v695_v63, %v899_v6  ;;  %684 = vst.msk [vmem:[#allocation5 - $0x7] sm:$0x80] %vm683_vm9, %v899_v6 }
 0x73f   :  { %v702_v8 = vmul.f32 %v701_v5, %v697_v7 }
 0x741   :  { %v703_v10 = vsel %vm51_vm2, %v702_v8, 0.0 }
 0x742   :  { %704 = vadd.xlane.f32.xlu0 %v703_v10 }
 0x743   :  { %933 = shalt.err (!%p930_p12)
}
 0x744   :  { %s934_s10 = scalar_lea.hbm %s1110_s4, 16 }
 0x745   :  { %p935_p13 = scmp.ne.s32.totalorder %s1110_s4, %s934_s10  ;;  %p938_p0 = scmp.lt.u32.totalorder %s934_s10, %s1110_s4 }
 0x747   :  { %p940_p1 = pnand %p938_p0, %p935_p13 }
 0x749   :  { %943 = shalt.err (!%p940_p1)
}
 0x74a   :  { %724 = dma.vmem_to_hbm [thread:$0]  %s722_s5, 16, %s1110_s4, [#allocation4]   ;;  %v708_v12 = vsub.s32 3, %v1024_v9  ;;  %vm711_vm10 = vcmask 7168  }
 0x74c   :  { %v709_v13 = vrot.slane %v1030_v11, %v708_v12 }
 0x7cf   :  { %v705_v14 = vpop.xlane.xlu0 %704 }
 0x7d0   :  { %v710_v15 = vadd.f32 %v709_v13, %v705_v14 }
 0x7d2   :  { %712 = vst.msk [vmem:[%s1109_s3] sm:$0xff] %vm711_vm10, %v710_v15 }
 0x7d3   :  { %946 = dma.done.wait [#allocation4], 16  }
 0x7d4   :  { %947 = vsyncadd [#allocation4], 4294967280 }
 0x7d5   :  { %730 = vsyncpa [#allocation3], 1 }
 0x7d6   :  { %731 = vsyncpa [#allocation4], 1 }

</bundles_post_ra>
